<compile_context>
chip_gen: v5e
topology: v5e:2x2
jax: 0.10.0
libtpu: 0.0.40
codegen_flags: <defaults>
</compile_context>

<pallas_src>
import functools
import math

import jax
import jax.numpy as jnp
from jax.experimental import pallas as pl
from jax.experimental.pallas import tpu as pltpu


# ---------------------------------------------------------------------------
# Prep kernel: L2-normalize rows of K = concat([z_i, z_j]), fold in 1/sqrt(tau)
# and cast to bf16 for the MXU.
# ---------------------------------------------------------------------------
def _normalize_kernel(x_ref, o_ref, *, inv_sqrt_tau: float):
    x = x_ref[...].astype(jnp.float32)
    ssq = jnp.sum(x * x, axis=-1, keepdims=True)
    # F.normalize(x, p=2, dim=-1, eps=1e-12)  ==  x * rsqrt(max(|x|^2, 1e-24))
    o_ref[...] = (x * jax.lax.rsqrt(jnp.maximum(ssq, 1e-24))
                  * inv_sqrt_tau).astype(o_ref.dtype)


# ---------------------------------------------------------------------------
# Main kernel: one grid step handles `block_rows` rows r of the first half and
# their mirrored rows r + B via a single (2*tb, N) logits tile.
# ---------------------------------------------------------------------------
def _simclr_loss_kernel(k_ref, out_ref, *, tau: float, block_rows: int,
                        batch: int):
    b = batch
    tb = block_rows
    n = 2 * b
    shift = 1.0 / tau            # max possible s/tau (cosine similarity <= 1)

    i = pl.program_id(0)
    start = i * tb
    # Clamp the (possibly ragged) last block; duplicated rows are masked below.
    r0 = jnp.minimum(start, b - tb)

    a_i = k_ref[pl.ds(r0, tb), :]            # (tb, D) bf16, rows r0 .. r0+tb
    a_j = k_ref[pl.ds(r0 + b, tb), :]        # (tb, D) bf16, mirrored rows
    lhs = jnp.concatenate([a_i, a_j], axis=0)            # (2tb, D) bf16

    # Single MXU matmul: (2tb, D) x (N, D) contracting the last dims of both.
    dn = (((1,), (1,)), ((), ()))
    logits = jax.lax.dot_general(lhs, k_ref[...], dn,
                                 preferred_element_type=jnp.float32)  # (2tb, N)
    # K is pre-scaled by rsqrt(tau), so logits == s / tau already.

    # Fused exp + diagonal mask + row-sum: one live (2tb, N) f32 tile.
    e = jnp.exp(logits - shift)
    row_l = jax.lax.broadcasted_iota(jnp.int32, (2 * tb, n), 0)
    col = jax.lax.broadcasted_iota(jnp.int32, (2 * tb, n), 1)
    self_col = r0 + row_l + jnp.where(row_l >= tb, b - tb, 0)
    e = jnp.where(col == self_col, 0.0, e)               # drop self-similarity
    denom = jnp.sum(e, axis=-1, keepdims=True)           # (2tb, 1), shifted
    denom = jnp.maximum(denom, jnp.finfo(jnp.float32).tiny)
    log_d = jnp.log(denom)

    # Positive pairs directly from the (tb, D) blocks (f32 VPU, already / tau).
    pos = jnp.sum(a_i.astype(jnp.float32) * a_j.astype(jnp.float32),
                  axis=-1, keepdims=True)                # (tb, 1)

    # Rows r and r+B share the positive:
    #   -log(exp(pos/tau) / denom_true) = -pos/tau + shift + log(denom_shifted)
    loss_pairs = 2.0 * (shift - pos) + log_d[0:tb, :] + log_d[tb:2 * tb, :]

    # Mask rows already covered by a previous (unclamped) block.
    global_row = r0 + jax.lax.broadcasted_iota(jnp.int32, (tb, 1), 0)
    loss_pairs = jnp.where(global_row >= start, loss_pairs, 0.0)

    partial = jnp.sum(loss_pairs) / (2.0 * b)
    out_ref[...] = jnp.full(out_ref.shape, partial, dtype=out_ref.dtype)


# ---------------------------------------------------------------------------
# Wrapper helpers
# ---------------------------------------------------------------------------
def _vmem_budget_bytes() -> int:
    try:
        phys = int(pltpu.get_tpu_info().vmem_capacity_bytes)
    except Exception:
        phys = 64 << 20          # conservative fallback: v7x has 64 MiB / TC
    # Leave ~25% headroom for compiler-internal scratch / spills.
    return max((phys * 3) // 4, 16 << 20)


def _live_bytes(tb: int, n: int, d: int) -> int:
    k_bytes = 2 * (n * d * 2)                 # resident bf16 K (double-buffered)
    logits = 2 * (2 * tb) * n * 4             # logits tile + exp/select headroom
    lhs = (2 * tb) * d * (2 + 4)              # bf16 LHS + f32 upcast of a_i/a_j
    return k_bytes + logits + lhs + (4 << 20)


def _pick_block_rows(b: int, n: int, d: int, budget: int, cap: int = 128) -> int:
    """Row-block over the first half of the batch (LHS has 2*tb rows)."""
    tb = min(b, cap)
    if tb > 8:
        tb -= tb % 8                          # sublane-aligned tiles
    while tb > 8 and _live_bytes(tb, n, d) > budget:
        tb = max(8, (tb // 2) - ((tb // 2) % 8))
    return tb
    # TODO(synk): for very large N*D (e.g. B>=8192, D>=512) add an inner column
    # block over K with per-row denom accumulators so VMEM scales as O(tb*N_col).


def simclr_loss(z_i, z_j, temperature: float = 0.1,
                block_rows: int | None = None):
    """Pallas SimCLR / NT-Xent loss. z_i, z_j: (B, D). Returns a scalar f32."""
    assert z_i.shape == z_j.shape and z_i.ndim == 2
    b, d = z_i.shape
    n = 2 * b
    tau = float(temperature)

    budget = _vmem_budget_bytes()
    if block_rows is None:
        block_rows = _pick_block_rows(b, n, d, budget)
    block_rows = min(block_rows, b)
    nblk = pl.cdiv(b, block_rows)

    # ---- prep: K = normalize(concat(z_i, z_j)) * rsqrt(tau), bf16 ----------
    k_raw = jnp.concatenate([z_i.astype(jnp.float32),
                             z_j.astype(jnp.float32)], axis=0)       # (N, D)
    rows_per_step = n
    if n > 8:
        max_rows = max(8, (((4 << 20) // (d * 4)) // 8) * 8)
        if n > max_rows:
            rows_per_step = max_rows
    k_scaled = pl.pallas_call(
        functools.partial(_normalize_kernel, inv_sqrt_tau=1.0 / math.sqrt(tau)),
        out_shape=jax.ShapeDtypeStruct((n, d), jnp.bfloat16),
        grid_spec=pltpu.PrefetchScalarGridSpec(
            num_scalar_prefetch=0,
            grid=(pl.cdiv(n, rows_per_step),),
            in_specs=[pl.BlockSpec((rows_per_step, d), lambda i: (i, 0))],
            out_specs=pl.BlockSpec((rows_per_step, d), lambda i: (i, 0)),
        ),
        compiler_params=pltpu.CompilerParams(
            dimension_semantics=("parallel",)),
    )(k_raw)

    # ---- main: O(N^2 D) similarity / NT-Xent loop ---------------------------
    vmem_limit = int(min(max(_live_bytes(block_rows, n, d), 16 << 20), budget))
    cost = pl.CostEstimate(
        flops=2 * n * n * d,               # one (2tb, D) x (D, N) matmul / step
        transcendentals=n * n + 2 * n,     # N^2 exp + 2N log
        bytes_accessed=n * d * 2 * nblk + nblk * 8 * 128 * 4,
    )
    # TODO(synk): constant-index K input is still double-buffered by default;
    # a single-buffer pipeline_mode would reclaim one N*D*2-byte copy.
    partials = pl.pallas_call(
        functools.partial(_simclr_loss_kernel, tau=tau,
                          block_rows=block_rows, batch=b),
        out_shape=jax.ShapeDtypeStruct((nblk, 8, 128), jnp.float32),
        grid_spec=pltpu.PrefetchScalarGridSpec(
            num_scalar_prefetch=0,
            grid=(nblk,),
            in_specs=[pl.BlockSpec((n, d), lambda i: (0, 0))],   # resident bf16 K
            out_specs=pl.BlockSpec((1, 8, 128), lambda i: (i, 0, 0)),
        ),
        compiler_params=pltpu.CompilerParams(
            dimension_semantics=("parallel",),   # independent steps -> both TCs on v7x
            vmem_limit_bytes=vmem_limit,
        ),
        cost_estimate=cost,
    )(k_scaled)

    # Tiny final reduction over per-block partial sums (each already / (2B)).
    return jnp.sum(partials[:, 0, 0])


# ---------------------------------------------------------------------------
# Plain-JAX reference mirroring the PyTorch module (world_size = 1).
# ---------------------------------------------------------------------------
def _simclr_loss_ref(z_i, z_j, temperature: float = 0.1):
    k = jnp.concatenate([z_i, z_j], axis=0).astype(jnp.float32)
    kn = k / jnp.maximum(jnp.linalg.norm(k, axis=-1, keepdims=True), 1e-12)
    s = jnp.dot(kn, kn.T, precision=jax.lax.Precision.HIGHEST)
    n = s.shape[0]
    b = n // 2
    sim_ij = jnp.diagonal(s, offset=b)
    sim_ji = jnp.diagonal(s, offset=-b)
    positives = jnp.concatenate([sim_ij, sim_ji], axis=0)
    nominator = jnp.exp(positives / temperature)
    mask = 1.0 - jnp.eye(n, dtype=jnp.float32)
    denominator = jnp.sum(mask * jnp.exp(s / temperature), axis=1)
    return jnp.sum(-jnp.log(nominator / denominator)) / n


if __name__ == "__main__":
    temperature = 0.1
    # The kernel deliberately uses bf16 MXU operands (perf review); against the
    # f32 HIGHEST-precision reference the expected deviation is O(1e-3) at
    # these sizes, so the tolerance is widened accordingly.
    TOL = 3e-2

    def check(loss, ref, tag):
        assert jnp.isfinite(loss), f"{tag}: loss is not finite"
        assert jnp.abs(loss - ref) < TOL, f"{tag}: kernel={loss} ref={ref}"

    k1, k2 = jax.random.split(jax.random.PRNGKey(0))

    # 1) Multi-block aligned path: B=16, D=64, row blocks of 8 -> grid of 2.
    z_i = jax.random.normal(k1, (16, 64), dtype=jnp.float32)
    z_j = jax.random.normal(k2, (16, 64), dtype=jnp.float32)
    loss = jax.block_until_ready(simclr_loss(z_i, z_j, temperature, block_rows=8))
    ref = jax.block_until_ready(_simclr_loss_ref(z_i, z_j, temperature))
    check(loss, ref, "aligned")

    # 2) Ragged last block: B=24 with row blocks of 16 -> last block clamps its
    #    start to row 8 and masks the 8 duplicated rows.
    k3, k4 = jax.random.split(jax.random.PRNGKey(1))
    z_i2 = jax.random.normal(k3, (24, 64), dtype=jnp.float32)
    z_j2 = jax.random.normal(k4, (24, 64), dtype=jnp.float32)
    loss2 = jax.block_until_ready(simclr_loss(z_i2, z_j2, temperature, block_rows=16))
    ref2 = jax.block_until_ready(_simclr_loss_ref(z_i2, z_j2, temperature))
    check(loss2, ref2, "ragged")

    # 3) Single-block default path: B=8, D=64 (grid of 1).
    k5, k6 = jax.random.split(jax.random.PRNGKey(2))
    z_i3 = jax.random.normal(k5, (8, 64), dtype=jnp.float32)
    z_j3 = jax.random.normal(k6, (8, 64), dtype=jnp.float32)
    loss3 = jax.block_until_ready(simclr_loss(z_i3, z_j3, temperature))
    ref3 = jax.block_until_ready(_simclr_loss_ref(z_i3, z_j3, temperature))
    check(loss3, ref3, "single-block")

    print("KERNEL_OK")
</pallas_src>

<mosaic_0001>
module attributes {stable_mosaic.version = 11 : i64} {
  func.func @_normalize_kernel(%arg0: i32, %arg1: memref<32x64xf32, #tpu.memory_space<vmem>>, %arg2: memref<32x64xbf16, #tpu.memory_space<vmem>>) attributes {dimension_semantics = [#tpu.dimension_semantics<parallel>], iteration_bounds = array<i64: 1>, scalar_prefetch = 0 : i64, scratch_operands = 0 : i64, tpu.core_type = #tpu.core_type<tc>, window_params = [{transform_indices = @transform_0, window_bounds = array<i64: 32, 64>}, {transform_indices = @transform_1, window_bounds = array<i64: 32, 64>}]} {
    %c0 = arith.constant 0 : index
    %c0_0 = arith.constant 0 : index
    %0 = vector.load %arg1[%c0, %c0_0] : memref<32x64xf32, #tpu.memory_space<vmem>>, vector<32x64xf32>
    %1 = arith.mulf %0, %0 : vector<32x64xf32>
    %cst = arith.constant dense<0.000000e+00> : vector<32xf32>
    %2 = vector.multi_reduction <add>, %1, %cst [1] : vector<32x64xf32> to vector<32xf32>
    %3 = vector.shape_cast %2 : vector<32xf32> to vector<32x1xf32>
    %cst_1 = arith.constant 1.000000e-24 : f32
    %4 = vector.broadcast %cst_1 : f32 to vector<32x1xf32>
    %5 = arith.maximumf %3, %4 : vector<32x1xf32>
    %6 = math.rsqrt %5 : vector<32x1xf32>
    %7 = vector.broadcast %6 : vector<32x1xf32> to vector<32x64xf32>
    %8 = arith.mulf %0, %7 : vector<32x64xf32>
    %cst_2 = arith.constant 3.1622777 : f32
    %9 = vector.broadcast %cst_2 : f32 to vector<32x64xf32>
    %10 = arith.mulf %8, %9 : vector<32x64xf32>
    %11 = arith.truncf %10 : vector<32x64xf32> to vector<32x64xbf16>
    %c0_3 = arith.constant 0 : index
    %c0_4 = arith.constant 0 : index
    %12 = vector.load %arg2[%c0_3, %c0_4] : memref<32x64xbf16, #tpu.memory_space<vmem>>, vector<32x64xbf16>
    tpu.vector_store %arg2[%c0_3, %c0_4], %11 {strides = array<i32>} : memref<32x64xbf16, #tpu.memory_space<vmem>>, vector<32x64xbf16>,
    return
  }
  func.func @transform_0(%arg0: i32) -> (i32, i32) {
    %c0_i32 = arith.constant 0 : i32
    %c0_i32_0 = arith.constant 0 : i32
    return %arg0, %c0_i32 : i32, i32
  }
  func.func @transform_1(%arg0: i32) -> (i32, i32) {
    %c0_i32 = arith.constant 0 : i32
    %c0_i32_0 = arith.constant 0 : i32
    return %arg0, %c0_i32 : i32, i32
  }
}

</mosaic_0001>

<bundles_post_ra>
// kernel: tpu_custom_call.1
= control target key start
LH: loop header
LB: loop body
LE: loop exit
PB: predicated region body
PF: predicated region fallthrough
CT: control target
= control target key end

     0   :  { %6 = vsyncpa [#allocation3], 0  ;;  %s228_s0 = inlined_call_operand.hbm [shape: f32[32,64], index: 0, kind: input, shape index: {}]   ;;  %s229_s1 = inlined_call_operand.hbm [shape: bf16[32,64], index: 1, kind: output, shape index: {}]  }
   0x1   :  { %7 = vsyncpa [#allocation4], 0  ;;  %s12_s8 = sshll.u32 %s228_s0, 4  ;;  %s192_s9 = smov [#allocation2]   ;;  %s13_s8 = int_to_ptr.hbm [resolvable:$true] %s12_s8 }
   0x2   :  { %s14_s10 = sshll.u32 %s192_s9, 4  ;;  %s193_s11 = smov 128   ;;  %s15_s10 = int_to_ptr.vmem [resolvable:$true] %s14_s10 }
   0x3   :  { %s194_s12 = smov 8  }
   0x4   :  { %20 = dma.hbm_to_vmem [thread:$0]  %s13_s8, 512, %s15_s10, [#allocation3], %s193_s11, %s193_s11, %s194_s12  }
   0x5   :  { %188 = dma.done.wait [#allocation3], 512  }
   0x6   :  { %189 = vsyncadd [#allocation3], 4294966784  ;;  %v27_v0 = vld [vmem:[#allocation2 + $0x10] sm:$0xff]  ;;  %vm33_vm0 = vcmask 523264   ;;  %v25_v1 = vld [vmem:[#allocation2] sm:$0xff]  ;;  %vm102_vm7 = vcmask 519168  }
   0x7   :  { %v31_v2 = vmul.f32 %v27_v0, %v27_v0  ;;  %v29_v3 = vmul.f32 %v25_v1, %v25_v1  ;;  %v211_v4 = vld [vmem:[#allocation2 + $0x18] sm:$0xff]  ;;  %v213_v5 = vld [vmem:[#allocation2 + $0x8] sm:$0xff]  ;;  %s195_s0 = smov [#allocation5]   ;;  %s113_s16 = sshll.u32 %s229_s1, 4  ;;  %s114_s16 = int_to_ptr.hbm [resolvable:$true] %s113_s16 }
   0x8   :  { %v32_v8 = vmul.f32 %v211_v4, %v211_v4  ;;  %v30_v9 = vmul.f32 %v213_v5, %v213_v5  ;;  %s111_s13 = sshll.u32 %s195_s0, 4  ;;  %s196_s17 = smov 64   ;;  %s112_s13 = int_to_ptr.vmem [resolvable:$true] %s111_s13 }
   0x9   :  { %v40_v6 = vsel %vm33_vm0, %v31_v2, 0.0  ;;  %v34_v7 = vsel %vm33_vm0, %v29_v3, 0.0  ;;  %s197_s18 = smov 4  }
   0xa   :  { %41 = vadd.xlane.f32.xlu1 %v40_v6  ;;  %35 = vadd.xlane.f32.xlu0 %v34_v7  ;;  %v43_v10 = vsel %vm33_vm0, %v32_v8, 0.0  ;;  %v37_v11 = vsel %vm33_vm0, %v30_v9, 0.0 }
  0x12   :  { %44 = vadd.xlane.f32.xlu1 %v43_v10  ;;  %38 = vadd.xlane.f32.xlu0 %v37_v11 }
  0x7d   :  { %v42_v12 = vpop.xlane.xlu1 %41  ;;  %v36_v13 = vpop.xlane.xlu0 %35 }
  0x7e   :  { %v48_v14 = vmax.f32 %v42_v12, 1e-24  ;;  %v46_v15 = vmax.f32 %v36_v13, 1e-24 }
  0x80   :  { %132 = vrsqrt.f32 %v48_v14  ;;  %vm76_vm3 = vweird.f32 %v48_v14  ;;  %vm56_vm5 = vweird.f32 %v46_v15 }
  0x81   :  { %134 = vrsqrt.f32 %v46_v15 }
  0x85   :  { %v45_v16 = vpop.xlane.xlu1 %44  ;;  %v39_v17 = vpop.xlane.xlu0 %38 }
  0x86   :  { %v133_v18 = vpop.eup %132  ;;  %v49_v19 = vmax.f32 %v45_v16, 1e-24  ;;  %v47_v20 = vmax.f32 %v39_v17, 1e-24 }
  0x87   :  { %v135_v21 = vpop.eup %134  ;;  %v71_v22 = vmul.f32 %v133_v18, %v48_v14  ;;  %vm77_vm1 = vweird.f32 %v133_v18 }
  0x88   :  { %v51_v23 = vmul.f32 %v135_v21, %v46_v15  ;;  %136 = vrsqrt.f32 %v49_v19  ;;  %vm57_vm2 = vweird.f32 %v135_v21  ;;  %vm78_vm4 = vmor %vm76_vm3, %vm77_vm1  ;;  %vm86_vm10 = vweird.f32 %v49_v19 }
  0x89   :  { %v72_v24 = vmul.f32 %v133_v18, %v71_v22  ;;  %138 = vrsqrt.f32 %v47_v20  ;;  %vm58_vm6 = vmor %vm56_vm5, %vm57_vm2  ;;  %vm66_vm12 = vweird.f32 %v47_v20 }
  0x8a   :  { %v52_v25 = vmul.f32 %v135_v21, %v51_v23 }
  0x8b   :  { %v73_v26 = vmul.f32 0.5, %v72_v24 }
  0x8c   :  { %v53_v27 = vmul.f32 0.5, %v52_v25 }
  0x8d   :  { %v74_v28 = vsub.f32 1.5, %v73_v26 }
  0x8e   :  { %v137_v29 = vpop.eup %136  ;;  %v54_v30 = vsub.f32 1.5, %v53_v27 }
  0x8f   :  { %v139_v31 = vpop.eup %138  ;;  %v75_v32 = vmul.f32 %v133_v18, %v74_v28  ;;  %v81_v33 = vmul.f32 %v137_v29, %v49_v19  ;;  %vm87_vm8 = vweird.f32 %v137_v29 }
  0x90   :  { %v55_v34 = vmul.f32 %v135_v21, %v54_v30  ;;  %v61_v35 = vmul.f32 %v139_v31, %v47_v20  ;;  %vm67_vm9 = vweird.f32 %v139_v31  ;;  %vm88_vm11 = vmor %vm86_vm10, %vm87_vm8 }
  0x91   :  { %v79_v36 = vsel %vm78_vm4, %v133_v18, %v75_v32  ;;  %v82_v37 = vmul.f32 %v137_v29, %v81_v33  ;;  %vm68_vm13 = vmor %vm66_vm12, %vm67_vm9 }
  0x92   :  { %v92_v38 = vmul.f32 %v79_v36, %v27_v0  ;;  %v59_v39 = vsel %vm58_vm6, %v135_v21, %v55_v34  ;;  %v62_v40 = vmul.f32 %v139_v31, %v61_v35 }
  0x93   :  { %v90_v41 = vmul.f32 %v59_v39, %v25_v1  ;;  %v83_v42 = vmul.f32 0.5, %v82_v37 }
  0x94   :  { %v96_v43 = vmul.f32 3.1622777, %v92_v38  ;;  %v63_v44 = vmul.f32 0.5, %v62_v40 }
  0x95   :  { %v94_v45 = vmul.f32 3.1622777, %v90_v41  ;;  %v84_v46 = vsub.f32 1.5, %v83_v42 }
  0x96   :  { %v100_v47 = vpack.c.bf16 %v96_v43, %v96_v43  ;;  %v64_v48 = vsub.f32 1.5, %v63_v44 }
  0x97   :  { %v98_v49 = vpack.c.bf16 %v94_v45, %v94_v45  ;;  %v85_v50 = vmul.f32 %v137_v29, %v84_v46 }
  0x98   :  { %105 = vst.msk [vmem:[#allocation5 + $0x8] sm:$0xf] %vm102_vm7, %v100_v47  ;;  %v65_v51 = vmul.f32 %v139_v31, %v64_v48 }
  0x99   :  { %103 = vst.msk [vmem:[#allocation5] sm:$0xf] %vm102_vm7, %v98_v49  ;;  %v89_v52 = vsel %vm88_vm11, %v137_v29, %v85_v50 }
  0x9a   :  { %v93_v53 = vmul.f32 %v89_v52, %v211_v4  ;;  %v69_v54 = vsel %vm68_vm13, %v139_v31, %v65_v51 }
  0x9b   :  { %v91_v55 = vmul.f32 %v69_v54, %v213_v5 }
  0x9c   :  { %v97_v56 = vmul.f32 3.1622777, %v93_v53 }
  0x9d   :  { %v95_v57 = vmul.f32 3.1622777, %v91_v55 }
  0x9e   :  { %v101_v58 = vpack.c.bf16 %v97_v56, %v97_v56 }
  0x9f   :  { %v99_v59 = vpack.c.bf16 %v95_v57, %v95_v57 }
  0xa0   :  { %106 = vst.msk [vmem:[#allocation5 + $0xc] sm:$0xf] %vm102_vm7, %v101_v58 }
  0xa1   :  { %104 = vst.msk [vmem:[#allocation5 + $0x4] sm:$0xf] %vm102_vm7, %v99_v59 }
  0xa2   :  { %119 = dma.vmem_to_hbm [thread:$0]  %s112_s13, 256, %s114_s16, [#allocation4], %s196_s17, %s196_s17, %s197_s18  }
  0xa3   :  { %190 = dma.done.wait [#allocation4], 256  }
  0xa4   :  { %191 = vsyncadd [#allocation4], 4294967040 }
  0xa5   :  { %124 = vsyncpa [#allocation3], 1 }
  0xa6   :  { %125 = vsyncpa [#allocation4], 1 }

</bundles_post_ra>
